<compile_context>
chip_gen: v7x
topology: tpu7x:2x2x1
jax: 0.10.0
libtpu: 0.0.40
codegen_flags: <defaults>
</compile_context>

<pallas_src>
import functools

import jax
import jax.numpy as jnp
from jax.experimental import pallas as pl
from jax.experimental.pallas import tpu as pltpu

BN_EPS = 1e-5


# ---------------------------------------------------------------------------
# Pass 1: fused conv (k x k, padded, no bias) + per-block partial BN statistics.
# ---------------------------------------------------------------------------
def _conv_stats_kernel(x_ref, w_ref, y_ref, stats_ref, *, kh_size, r_block, w_out):
    # x_ref:     (1, H+2p, W_out, KW*C_in)   bf16   (KW-folded, halo'd input)
    # w_ref:     (KH, KW*C_in, C_out)        bf16
    # y_ref:     (1, r_block, W_out, C_out)  bf16   (conv output row block)
    # stats_ref: (1, 1, 2, C_out)            f32    (partial [sum; sum_of_sq])
    c_out = y_ref.shape[-1]
    kc = x_ref.shape[-1]                        # KW * C_in
    r0 = pl.program_id(1) * r_block             # first output row of this block

    # KH accumulating MXU dots: M = r_block*W_out, K = KW*C_in, N = C_out.
    acc = jnp.zeros((r_block * w_out, c_out), jnp.float32)
    for kh in range(kh_size):                   # static, short (KH = 3)
        lhs = x_ref[0, pl.ds(r0 + kh, r_block), :, :]        # (r_block, W_out, KC)
        acc = acc + jnp.dot(lhs.reshape(r_block * w_out, kc), w_ref[kh],
                            preferred_element_type=jnp.float32)

    # bf16 intermediate: halves HBM traffic for the memory-bound pass 2.
    y_ref[0] = acc.reshape(r_block, w_out, c_out).astype(y_ref.dtype)

    # Per-step partial stats (unique output block per grid step) -> both grid
    # axes stay "parallel"; the tiny cross-step reduction happens in the wrapper.
    stats_ref[0, 0] = jnp.concatenate(
        [jnp.sum(acc, axis=0, keepdims=True),
         jnp.sum(acc * acc, axis=0, keepdims=True)], axis=0)


def _pick_row_block(h_out, w_out, target_m=256):
    """Smallest divisor r of h_out with r * w_out >= target_m (MXU M depth on
    v6e/v7x; >=128 already fills v5e), falling back to h_out itself."""
    for r in range(1, h_out + 1):
        if h_out % r == 0 and r * w_out >= target_m:
            return r
    return h_out


def _conv_and_batch_stats(x_packed, w_packed, h_out, w_out, r_block):
    b, h_pad, _, kc = x_packed.shape
    kh_size, _, c_out = w_packed.shape
    nrb = h_out // r_block

    kernel = functools.partial(_conv_stats_kernel, kh_size=kh_size,
                               r_block=r_block, w_out=w_out)
    flops = 2 * b * h_out * w_out * kh_size * kc * c_out
    bytes_accessed = (x_packed.size * 2 + w_packed.size * 2
                      + b * h_out * w_out * c_out * 2        # bf16 y write
                      + b * nrb * 2 * c_out * 4)             # partial stats

    return pl.pallas_call(
        kernel,
        out_shape=(
            jax.ShapeDtypeStruct((b, h_out, w_out, c_out), jnp.bfloat16),
            jax.ShapeDtypeStruct((b, nrb, 2, c_out), jnp.float32),
        ),
        grid=(b, nrb),
        in_specs=[
            # Whole padded (KW-folded) image per batch element: tiny at small
            # C_in, and the block index is constant across the row-block axis
            # so the pipeliner does not re-fetch it.
            pl.BlockSpec((1, h_pad, w_out, kc), lambda i, j: (i, 0, 0, 0)),
            pl.BlockSpec((kh_size, kc, c_out), lambda i, j: (0, 0, 0)),
        ],
        out_specs=(
            pl.BlockSpec((1, r_block, w_out, c_out), lambda i, j: (i, j, 0, 0)),
            pl.BlockSpec((1, 1, 2, c_out), lambda i, j: (i, j, 0, 0)),
        ),
        compiler_params=pltpu.CompilerParams(
            dimension_semantics=("parallel", "parallel")),
        cost_estimate=pl.CostEstimate(flops=flops, transcendentals=0,
                                      bytes_accessed=bytes_accessed),
    )(x_packed, w_packed)


# ---------------------------------------------------------------------------
# Pass 2: row-tiled (folded) BatchNorm affine + ReLU over the bf16 conv output.
# ---------------------------------------------------------------------------
def _bn_relu_kernel(y_ref, scale_ref, shift_ref, o_ref):
    y = y_ref[...].astype(jnp.float32)
    o_ref[...] = jnp.maximum(y * scale_ref[...] + shift_ref[...], 0.0)


def _pick_row_tile(rows):
    # Memory-bound elementwise: 512-1024-row lane-dense tiles reach ~85% of HBM
    # BW vs ~63% at 256.  Non-divisible tails are handled by the cdiv grid
    # (out-of-bounds writes are dropped).
    if rows >= 1024:
        return 1024
    if rows >= 512:
        return 512
    return rows                                  # single full block


def _bn_relu_apply(y2d, scale, shift):
    rows, c_out = y2d.shape
    tile = _pick_row_tile(rows)
    flops = 3 * rows * c_out
    bytes_accessed = rows * c_out * 2 + rows * c_out * 4 + 2 * c_out * 4
    return pl.pallas_call(
        _bn_relu_kernel,
        out_shape=jax.ShapeDtypeStruct((rows, c_out), jnp.float32),
        grid=(pl.cdiv(rows, tile),),
        in_specs=[
            pl.BlockSpec((tile, c_out), lambda i: (i, 0)),
            pl.BlockSpec((1, c_out), lambda i: (0, 0)),
            pl.BlockSpec((1, c_out), lambda i: (0, 0)),
        ],
        out_specs=pl.BlockSpec((tile, c_out), lambda i: (i, 0)),
        compiler_params=pltpu.CompilerParams(dimension_semantics=("parallel",)),
        cost_estimate=pl.CostEstimate(flops=flops, transcendentals=0,
                                      bytes_accessed=bytes_accessed),
    )(y2d, scale, shift)


# ---------------------------------------------------------------------------
# Public wrapper: PyTorch-layout in, PyTorch-layout out.
# ---------------------------------------------------------------------------
@functools.partial(jax.jit, static_argnames=("kernel_size", "padding"))
def conv_batch_block_forward(x, weight, gamma, beta, kernel_size=3, padding=1):
    """x: (B, C_in, H, W) NCHW; weight: (C_out, C_in, KH, KW) (PyTorch Conv2d
    layout); gamma/beta: (1, C_out).  Returns (B, C_out, H_out, W_out) NCHW."""
    b, c_in, h, w = x.shape
    c_out = weight.shape[0]
    kh = kw = kernel_size
    h_out = h + 2 * padding - kh + 1
    w_out = w + 2 * padding - kw + 1

    # Input prep (tiny vs the C_out=128 output): NCHW -> NHWC, halo pad, then
    # KW-fold pack so each conv tap contracts over K = KW*C_in and matmul
    # operands are bf16 (f32 accumulation stays in-kernel).
    x_nhwc = jnp.transpose(x, (0, 2, 3, 1))
    x_pad = jnp.pad(x_nhwc, ((0, 0), (padding, padding), (padding, padding), (0, 0)))
    x_packed = jnp.concatenate(
        [x_pad[:, :, k:k + w_out, :] for k in range(kw)], axis=-1
    ).astype(jnp.bfloat16)                                      # (B, H+2p, W_out, KW*C_in)
    w_packed = jnp.transpose(weight, (2, 3, 1, 0)).reshape(
        kh, kw * c_in, c_out).astype(jnp.bfloat16)              # (KH, KW*C_in, C_out)

    r_block = _pick_row_block(h_out, w_out)
    y, stats = _conv_and_batch_stats(x_packed, w_packed, h_out, w_out, r_block)

    # Fold training-mode BatchNorm (batch statistics, biased variance) into a
    # per-channel scale/shift once (tiny XLA ops), so pass 2 is a pure fma+relu.
    totals = jnp.sum(stats, axis=(0, 1))                        # (2, C_out) f32
    n = float(b * h_out * w_out)
    mean = totals[0] / n
    var = jnp.maximum(totals[1] / n - mean * mean, 0.0)         # biased, like PyTorch BN
    scale = gamma.reshape(-1).astype(jnp.float32) * jax.lax.rsqrt(var + BN_EPS)
    shift = beta.reshape(-1).astype(jnp.float32) - mean * scale

    out2d = _bn_relu_apply(y.reshape(b * h_out * w_out, c_out),
                           scale.reshape(1, c_out), shift.reshape(1, c_out))
    out = out2d.reshape(b, h_out, w_out, c_out)
    # TODO(synk): return NHWC if the consumer allows it — this transpose is an
    # extra HBM round trip kept only to match the PyTorch NCHW contract.
    return jnp.transpose(out, (0, 3, 1, 2))


# ---------------------------------------------------------------------------
# Pure-JAX reference (bf16-rounded conv operands, f32 conv & stats).  The kernel
# additionally stores the conv intermediate in bf16 (a deliberate perf choice),
# which adds up to ~1 bf16 ulp * |normalized value| of error (~1e-2 worst case),
# hence the tolerances below.
# ---------------------------------------------------------------------------
def _reference(x, weight, gamma, beta, padding=1):
    xb = x.astype(jnp.bfloat16).astype(jnp.float32)
    wb = weight.astype(jnp.bfloat16).astype(jnp.float32)
    y = jax.lax.conv_general_dilated(
        xb, wb, window_strides=(1, 1),
        padding=((padding, padding), (padding, padding)),
        dimension_numbers=("NCHW", "OIHW", "NCHW"),
        precision=jax.lax.Precision.HIGHEST)
    mean = jnp.mean(y, axis=(0, 2, 3), keepdims=True)
    var = jnp.var(y, axis=(0, 2, 3), keepdims=True)             # biased, like PyTorch BN
    yhat = (y - mean) / jnp.sqrt(var + BN_EPS)
    out = yhat * gamma.reshape(1, -1, 1, 1) + beta.reshape(1, -1, 1, 1)
    return jnp.maximum(out, 0.0)


if __name__ == "__main__":
    key = jax.random.PRNGKey(0)
    kx, kw_, kg, kb = jax.random.split(key, 4)

    B, C_IN, C_OUT, H, W = 2, 4, 128, 16, 16
    x = jax.random.normal(kx, (B, C_IN, H, W), jnp.float32)
    weight = jax.random.normal(kw_, (C_OUT, C_IN, 3, 3), jnp.float32) / jnp.sqrt(9 * C_IN)
    gamma = 1.0 + 0.1 * jax.random.normal(kg, (1, C_OUT), jnp.float32)
    beta = 0.1 * jax.random.normal(kb, (1, C_OUT), jnp.float32)

    out = conv_batch_block_forward(x, weight, gamma, beta)
    out = jax.block_until_ready(out)

    assert out.shape == (B, C_OUT, H, W)
    assert bool(jnp.all(jnp.isfinite(out)))
    assert bool(jnp.all(out >= 0.0))                            # ReLU range

    ref = _reference(x, weight, gamma, beta)
    err = jnp.abs(out - ref)
    max_err = float(jnp.max(err))
    mean_err = float(jnp.mean(err))
    # Max error budget is dominated by the bf16 conv intermediate (perf-review
    # choice); mean error stays well below 1e-3.
    assert max_err < 4e-2, f"max abs err vs reference: {max_err}"
    assert mean_err < 3e-3, f"mean abs err vs reference: {mean_err}"

    print("KERNEL_OK")
</pallas_src>

<mosaic_0001>
module attributes {stable_mosaic.version = 11 : i64} {
  func.func @_conv_stats_kernel(%arg0: i32, %arg1: i32, %arg2: memref<1x18x16x12xbf16, #tpu.memory_space<vmem>>, %arg3: memref<3x12x128xbf16, #tpu.memory_space<vmem>>, %arg4: memref<1x16x16x128xbf16, #tpu.memory_space<vmem>>, %arg5: memref<1x1x2x128xf32, #tpu.memory_space<vmem>>) attributes {dimension_semantics = [#tpu.dimension_semantics<parallel>, #tpu.dimension_semantics<parallel>], iteration_bounds = array<i64: 2, 1>, scalar_prefetch = 0 : i64, scratch_operands = 0 : i64, tpu.core_type = #tpu.core_type<tc>, window_params = [{transform_indices = @transform_0, window_bounds = array<i64: 1, 18, 16, 12>}, {pipeline_mode = #tpu.pipeline_mode<synchronous>, transform_indices = @transform_1, window_bounds = array<i64: 3, 12, 128>}, {transform_indices = @transform_2, window_bounds = array<i64: 1, 16, 16, 128>}, {transform_indices = @transform_3, window_bounds = array<i64: 1, 1, 2, 128>}]} {
    %c16_i32 = arith.constant 16 : i32
    %0 = arith.muli %arg1, %c16_i32 : i32
    %cst = arith.constant 0.000000e+00 : f32
    %1 = vector.broadcast %cst : f32 to vector<256x128xf32>
    %c0_i32 = arith.constant 0 : i32
    %2 = arith.addi %0, %c0_i32 : i32
    %c0 = arith.constant 0 : index
    %3 = arith.index_cast %2 : i32 to index
    %c0_0 = arith.constant 0 : index
    %c0_1 = arith.constant 0 : index
    %4 = vector.load %arg2[%c0, %3, %c0_0, %c0_1] : memref<1x18x16x12xbf16, #tpu.memory_space<vmem>>, vector<1x16x16x12xbf16>
    %5 = vector.shape_cast %4 : vector<1x16x16x12xbf16> to vector<16x16x12xbf16>
    %6 = vector.shape_cast %5 : vector<16x16x12xbf16> to vector<256x12xbf16>
    %c0_2 = arith.constant 0 : index
    %c0_3 = arith.constant 0 : index
    %c0_4 = arith.constant 0 : index
    %7 = vector.load %arg3[%c0_2, %c0_3, %c0_4] : memref<3x12x128xbf16, #tpu.memory_space<vmem>>, vector<1x12x128xbf16>
    %8 = vector.shape_cast %7 : vector<1x12x128xbf16> to vector<12x128xbf16>
    %cst_5 = arith.constant dense<0.000000e+00> : vector<256x128xf32>
    %9 = tpu.matmul %6, %8, %cst_5 {dimension_numbers = #tpu.dot_dimension_numbers<[1], [0], [0], [1], [0, 0, 1, 1], [], []>} : vector<256x12xbf16>, vector<12x128xbf16>, vector<256x128xf32> -> vector<256x128xf32>
    %10 = arith.addf %1, %9 : vector<256x128xf32>
    %c1_i32 = arith.constant 1 : i32
    %11 = arith.addi %0, %c1_i32 : i32
    %c0_6 = arith.constant 0 : index
    %12 = arith.index_cast %11 : i32 to index
    %c0_7 = arith.constant 0 : index
    %c0_8 = arith.constant 0 : index
    %13 = vector.load %arg2[%c0_6, %12, %c0_7, %c0_8] : memref<1x18x16x12xbf16, #tpu.memory_space<vmem>>, vector<1x16x16x12xbf16>
    %14 = vector.shape_cast %13 : vector<1x16x16x12xbf16> to vector<16x16x12xbf16>
    %15 = vector.shape_cast %14 : vector<16x16x12xbf16> to vector<256x12xbf16>
    %c1 = arith.constant 1 : index
    %c0_9 = arith.constant 0 : index
    %c0_10 = arith.constant 0 : index
    %16 = vector.load %arg3[%c1, %c0_9, %c0_10] : memref<3x12x128xbf16, #tpu.memory_space<vmem>>, vector<1x12x128xbf16>
    %17 = vector.shape_cast %16 : vector<1x12x128xbf16> to vector<12x128xbf16>
    %cst_11 = arith.constant dense<0.000000e+00> : vector<256x128xf32>
    %18 = tpu.matmul %15, %17, %cst_11 {dimension_numbers = #tpu.dot_dimension_numbers<[1], [0], [0], [1], [0, 0, 1, 1], [], []>} : vector<256x12xbf16>, vector<12x128xbf16>, vector<256x128xf32> -> vector<256x128xf32>
    %19 = arith.addf %10, %18 : vector<256x128xf32>
    %c2_i32 = arith.constant 2 : i32
    %20 = arith.addi %0, %c2_i32 : i32
    %c0_12 = arith.constant 0 : index
    %21 = arith.index_cast %20 : i32 to index
    %c0_13 = arith.constant 0 : index
    %c0_14 = arith.constant 0 : index
    %22 = vector.load %arg2[%c0_12, %21, %c0_13, %c0_14] : memref<1x18x16x12xbf16, #tpu.memory_space<vmem>>, vector<1x16x16x12xbf16>
    %23 = vector.shape_cast %22 : vector<1x16x16x12xbf16> to vector<16x16x12xbf16>
    %24 = vector.shape_cast %23 : vector<16x16x12xbf16> to vector<256x12xbf16>
    %c2 = arith.constant 2 : index
    %c0_15 = arith.constant 0 : index
    %c0_16 = arith.constant 0 : index
    %25 = vector.load %arg3[%c2, %c0_15, %c0_16] : memref<3x12x128xbf16, #tpu.memory_space<vmem>>, vector<1x12x128xbf16>
    %26 = vector.shape_cast %25 : vector<1x12x128xbf16> to vector<12x128xbf16>
    %cst_17 = arith.constant dense<0.000000e+00> : vector<256x128xf32>
    %27 = tpu.matmul %24, %26, %cst_17 {dimension_numbers = #tpu.dot_dimension_numbers<[1], [0], [0], [1], [0, 0, 1, 1], [], []>} : vector<256x12xbf16>, vector<12x128xbf16>, vector<256x128xf32> -> vector<256x128xf32>
    %28 = arith.addf %19, %27 : vector<256x128xf32>
    %29 = vector.shape_cast %28 : vector<256x128xf32> to vector<16x16x128xf32>
    %30 = arith.truncf %29 : vector<16x16x128xf32> to vector<16x16x128xbf16>
    %c0_18 = arith.constant 0 : index
    %c0_19 = arith.constant 0 : index
    %c0_20 = arith.constant 0 : index
    %c0_21 = arith.constant 0 : index
    %31 = vector.load %arg4[%c0_18, %c0_19, %c0_20, %c0_21] : memref<1x16x16x128xbf16, #tpu.memory_space<vmem>>, vector<1x16x16x128xbf16>
    %32 = vector.shape_cast %31 : vector<1x16x16x128xbf16> to vector<16x16x128xbf16>
    %33 = vector.shape_cast %30 : vector<16x16x128xbf16> to vector<1x16x16x128xbf16>
    tpu.vector_store %arg4[%c0_18, %c0_19, %c0_20, %c0_21], %33 {strides = array<i32>} : memref<1x16x16x128xbf16, #tpu.memory_space<vmem>>, vector<1x16x16x128xbf16>,
    %cst_22 = arith.constant dense<0.000000e+00> : vector<128xf32>
    %34 = vector.multi_reduction <add>, %28, %cst_22 [0] : vector<256x128xf32> to vector<128xf32>
    %35 = vector.shape_cast %34 : vector<128xf32> to vector<1x128xf32>
    %36 = arith.mulf %28, %28 : vector<256x128xf32>
    %cst_23 = arith.constant dense<0.000000e+00> : vector<128xf32>
    %37 = vector.multi_reduction <add>, %36, %cst_23 [0] : vector<256x128xf32> to vector<128xf32>
    %38 = vector.shape_cast %37 : vector<128xf32> to vector<1x128xf32>
    %39 = tpu.concatenate %35, %38 in 0 : vector<1x128xf32>, vector<1x128xf32> -> vector<2x128xf32>
    %c0_24 = arith.constant 0 : index
    %c0_25 = arith.constant 0 : index
    %c0_26 = arith.constant 0 : index
    %c0_27 = arith.constant 0 : index
    %40 = vector.load %arg5[%c0_24, %c0_25, %c0_26, %c0_27] : memref<1x1x2x128xf32, #tpu.memory_space<vmem>>, vector<1x1x2x128xf32>
    %41 = vector.shape_cast %40 : vector<1x1x2x128xf32> to vector<2x128xf32>
    %42 = vector.shape_cast %39 : vector<2x128xf32> to vector<1x1x2x128xf32>
    tpu.vector_store %arg5[%c0_24, %c0_25, %c0_26, %c0_27], %42 {strides = array<i32>} : memref<1x1x2x128xf32, #tpu.memory_space<vmem>>, vector<1x1x2x128xf32>,
    return
  }
  func.func @transform_0(%arg0: i32, %arg1: i32) -> (i32, i32, i32, i32) {
    %c0_i32 = arith.constant 0 : i32
    %c0_i32_0 = arith.constant 0 : i32
    %c0_i32_1 = arith.constant 0 : i32
    %c0_i32_2 = arith.constant 0 : i32
    return %arg0, %c0_i32, %c0_i32_0, %c0_i32_1 : i32, i32, i32, i32
  }
  func.func @transform_1(%arg0: i32, %arg1: i32) -> (i32, i32, i32) {
    %c0_i32 = arith.constant 0 : i32
    %c0_i32_0 = arith.constant 0 : i32
    %c0_i32_1 = arith.constant 0 : i32
    %c0_i32_2 = arith.constant 0 : i32
    return %c0_i32, %c0_i32_0, %c0_i32_1 : i32, i32, i32
  }
  func.func @transform_2(%arg0: i32, %arg1: i32) -> (i32, i32, i32, i32) {
    %c0_i32 = arith.constant 0 : i32
    %c0_i32_0 = arith.constant 0 : i32
    %c0_i32_1 = arith.constant 0 : i32
    return %arg0, %arg1, %c0_i32, %c0_i32_0 : i32, i32, i32, i32
  }
  func.func @transform_3(%arg0: i32, %arg1: i32) -> (i32, i32, i32, i32) {
    %c0_i32 = arith.constant 0 : i32
    %c0_i32_0 = arith.constant 0 : i32
    %c0_i32_1 = arith.constant 0 : i32
    return %arg0, %arg1, %c0_i32, %c0_i32_0 : i32, i32, i32, i32
  }
}

module attributes {stable_mosaic.version = 11 : i64} {
  func.func @_bn_relu_kernel(%arg0: i32, %arg1: memref<512x128xbf16, #tpu.memory_space<vmem>>, %arg2: memref<1x128xf32, #tpu.memory_space<vmem>>, %arg3: memref<1x128xf32, #tpu.memory_space<vmem>>, %arg4: memref<512x128xf32, #tpu.memory_space<vmem>>) attributes {dimension_semantics = [#tpu.dimension_semantics<parallel>], iteration_bounds = array<i64: 1>, scalar_prefetch = 0 : i64, scratch_operands = 0 : i64, tpu.core_type = #tpu.core_type<tc>, window_params = [{transform_indices = @transform_0, window_bounds = array<i64: 512, 128>}, {pipeline_mode = #tpu.pipeline_mode<synchronous>, transform_indices = @transform_1, window_bounds = array<i64: 1, 128>}, {pipeline_mode = #tpu.pipeline_mode<synchronous>, transform_indices = @transform_2, window_bounds = array<i64: 1, 128>}, {transform_indices = @transform_3, window_bounds = array<i64: 512, 128>}]} {
    %c0 = arith.constant 0 : index
    %c0_0 = arith.constant 0 : index
    %0 = vector.load %arg1[%c0, %c0_0] : memref<512x128xbf16, #tpu.memory_space<vmem>>, vector<512x128xbf16>
    %1 = arith.extf %0 : vector<512x128xbf16> to vector<512x128xf32>
    %c0_1 = arith.constant 0 : index
    %c0_2 = arith.constant 0 : index
    %2 = vector.load %arg2[%c0_1, %c0_2] : memref<1x128xf32, #tpu.memory_space<vmem>>, vector<1x128xf32>
    %3 = vector.broadcast %2 : vector<1x128xf32> to vector<512x128xf32>
    %4 = arith.mulf %1, %3 : vector<512x128xf32>
    %c0_3 = arith.constant 0 : index
    %c0_4 = arith.constant 0 : index
    %5 = vector.load %arg3[%c0_3, %c0_4] : memref<1x128xf32, #tpu.memory_space<vmem>>, vector<1x128xf32>
    %6 = vector.broadcast %5 : vector<1x128xf32> to vector<512x128xf32>
    %7 = arith.addf %4, %6 : vector<512x128xf32>
    %cst = arith.constant 0.000000e+00 : f32
    %8 = vector.broadcast %cst : f32 to vector<512x128xf32>
    %9 = arith.maximumf %7, %8 : vector<512x128xf32>
    %c0_5 = arith.constant 0 : index
    %c0_6 = arith.constant 0 : index
    %10 = vector.load %arg4[%c0_5, %c0_6] : memref<512x128xf32, #tpu.memory_space<vmem>>, vector<512x128xf32>
    tpu.vector_store %arg4[%c0_5, %c0_6], %9 {strides = array<i32>} : memref<512x128xf32, #tpu.memory_space<vmem>>, vector<512x128xf32>,
    return
  }
  func.func @transform_0(%arg0: i32) -> (i32, i32) {
    %c0_i32 = arith.constant 0 : i32
    %c0_i32_0 = arith.constant 0 : i32
    return %arg0, %c0_i32 : i32, i32
  }
  func.func @transform_1(%arg0: i32) -> (i32, i32) {
    %c0_i32 = arith.constant 0 : i32
    %c0_i32_0 = arith.constant 0 : i32
    %c0_i32_1 = arith.constant 0 : i32
    return %c0_i32, %c0_i32_0 : i32, i32
  }
  func.func @transform_2(%arg0: i32) -> (i32, i32) {
    %c0_i32 = arith.constant 0 : i32
    %c0_i32_0 = arith.constant 0 : i32
    %c0_i32_1 = arith.constant 0 : i32
    return %c0_i32, %c0_i32_0 : i32, i32
  }
  func.func @transform_3(%arg0: i32) -> (i32, i32) {
    %c0_i32 = arith.constant 0 : i32
    %c0_i32_0 = arith.constant 0 : i32
    return %arg0, %c0_i32 : i32, i32
  }
}

</mosaic_0001>

<bundles_post_ra>
// kernel: conv_batch_block_forward.3
= control target key start
LH: loop header
LB: loop body
LE: loop exit
PB: predicated region body
PF: predicated region fallthrough
CT: control target
= control target key end

     0   :  { %s886_s0 = inlined_call_operand.vmem [shape: bf16[512,128], index: 0, kind: input, shape index: {}]   ;;  %s887_s1 = inlined_call_operand.vmem [shape: f32[1,128], index: 1, kind: input, shape index: {}]   ;;  %s888_s2 = inlined_call_operand.vmem [shape: f32[1,128], index: 2, kind: input, shape index: {}]   ;;  %s889_s3 = inlined_call_operand.hbm [shape: f32[512,128], index: 3, kind: output, shape index: {}]  }
   0x1   :  { %v432_v0 = vld [vmem:[%s886_s0] sm:$0xff]   ;;  %v559_v4 = vld [vmem:[%s886_s0 + $0x8] sm:$0xff]   ;;  %v560_v5 = vld [vmem:[%s886_s0 + $0x10] sm:$0xff]  }
   0x2   :  { %v646_v1 = vld [vmem:[%s887_s1] ss:$0 sm:$0xff]  ;;  %v433_v2 = vunpack.c.l.bf16 %v432_v0  ;;  %v434_v3 = vunpack.c.h.bf16 %v432_v0  ;;  %v561_v6 = vld [vmem:[%s886_s0 + $0x18] sm:$0xff]   ;;  %v437_v8 = vunpack.c.l.bf16 %v559_v4  ;;  %v438_v9 = vunpack.c.h.bf16 %v559_v4  ;;  %v563_v33 = vld [vmem:[%s886_s0 + $0x28] sm:$0xff]  }
   0x3   :  { %v660_v7 = vld [vmem:[%s888_s2] ss:$0 sm:$0xff]  ;;  %v441_v10 = vunpack.c.l.bf16 %v560_v5  ;;  %v442_v11 = vunpack.c.h.bf16 %v560_v5  ;;  %v445_v14 = vunpack.c.l.bf16 %v561_v6  ;;  %v446_v15 = vunpack.c.h.bf16 %v561_v6  ;;  %v564_v34 = vld [vmem:[%s886_s0 + $0x30] sm:$0xff]   ;;  %v565_v39 = vld [vmem:[%s886_s0 + $0x38] sm:$0xff]  }
   0x4   :  { %v150_v12 = vmul.f32 %v433_v2, %v646_v1  ;;  %v151_v13 = vmul.f32 %v434_v3, %v646_v1  ;;  %v152_v16 = vmul.f32 %v437_v8, %v646_v1  ;;  %v153_v17 = vmul.f32 %v438_v9, %v646_v1  ;;  %v562_v28 = vld [vmem:[%s886_s0 + $0x20] sm:$0xff]  }
   0x5   :  { %v154_v18 = vmul.f32 %v441_v10, %v646_v1  ;;  %v155_v19 = vmul.f32 %v442_v11, %v646_v1  ;;  %v156_v22 = vmul.f32 %v445_v14, %v646_v1  ;;  %v157_v23 = vmul.f32 %v446_v15, %v646_v1 }
   0x6   :  { %v221_v20 = vadd.f32 %v660_v7, %v150_v12  ;;  %v222_v21 = vadd.f32 %v660_v7, %v151_v13  ;;  %v223_v24 = vadd.f32 %v660_v7, %v152_v16  ;;  %v224_v25 = vadd.f32 %v660_v7, %v153_v17 }
   0x7   :  { %v225_v26 = vadd.f32 %v660_v7, %v154_v18  ;;  %v226_v27 = vadd.f32 %v660_v7, %v155_v19  ;;  %v227_v31 = vadd.f32 %v660_v7, %v156_v22  ;;  %v228_v32 = vadd.f32 %v660_v7, %v157_v23 }
   0x8   :  { %v285_v29 = vmax.f32 %v221_v20, 0.0  ;;  %v286_v30 = vmax.f32 %v222_v21, 0.0  ;;  %v287_v35 = vmax.f32 %v223_v24, 0.0  ;;  %v288_v36 = vmax.f32 %v224_v25, 0.0 }
   0x9   :  { %v289_v37 = vmax.f32 %v225_v26, 0.0  ;;  %v290_v38 = vmax.f32 %v226_v27, 0.0  ;;  %v291_v40 = vmax.f32 %v227_v31, 0.0  ;;  %v292_v41 = vmax.f32 %v228_v32, 0.0 }
   0xa   :  { %349 = vst [vmem:[#allocation2] sm:$0xff] %v285_v29  ;;  %350 = vst [vmem:[#allocation2 + $0x8] sm:$0xff] %v286_v30  ;;  %v449_v42 = vunpack.c.l.bf16 %v562_v28  ;;  %v450_v43 = vunpack.c.h.bf16 %v562_v28  ;;  %v453_v44 = vunpack.c.l.bf16 %v563_v33  ;;  %v454_v45 = vunpack.c.h.bf16 %v563_v33 }
   0xb   :  { %351 = vst [vmem:[#allocation2 + $0x10] sm:$0xff] %v287_v35  ;;  %352 = vst [vmem:[#allocation2 + $0x18] sm:$0xff] %v288_v36  ;;  %v457_v46 = vunpack.c.l.bf16 %v564_v34  ;;  %v458_v47 = vunpack.c.h.bf16 %v564_v34  ;;  %v461_v50 = vunpack.c.l.bf16 %v565_v39  ;;  %v462_v51 = vunpack.c.h.bf16 %v565_v39 }
   0xc   :  { %353 = vst [vmem:[#allocation2 + $0x20] sm:$0xff] %v289_v37  ;;  %354 = vst [vmem:[#allocation2 + $0x28] sm:$0xff] %v290_v38  ;;  %v158_v48 = vmul.f32 %v449_v42, %v646_v1  ;;  %v159_v49 = vmul.f32 %v450_v43, %v646_v1 }
   0xd   :  { %355 = vst [vmem:[#allocation2 + $0x30] sm:$0xff] %v291_v40  ;;  %356 = vst [vmem:[#allocation2 + $0x38] sm:$0xff] %v292_v41 }
   0xe   :  { %8 = vsyncpa [#allocation3], 0  ;;  %v160_v52 = vmul.f32 %v453_v44, %v646_v1  ;;  %v161_v53 = vmul.f32 %v454_v45, %v646_v1  ;;  %v162_v54 = vmul.f32 %v457_v46, %v646_v1  ;;  %v163_v55 = vmul.f32 %v458_v47, %v646_v1  ;;  %v566_v0 = vld [vmem:[%s886_s0 + $0x40] sm:$0xff]   ;;  %v567_v6 = vld [vmem:[%s886_s0 + $0x48] sm:$0xff]  }
   0xf   :  { %v229_v56 = vadd.f32 %v660_v7, %v158_v48  ;;  %v230_v57 = vadd.f32 %v660_v7, %v159_v49  ;;  %v164_v58 = vmul.f32 %v461_v50, %v646_v1  ;;  %v165_v59 = vmul.f32 %v462_v51, %v646_v1  ;;  %v568_v8 = vld [vmem:[%s886_s0 + $0x50] sm:$0xff]   ;;  %v569_v13 = vld [vmem:[%s886_s0 + $0x58] sm:$0xff]   ;;  %v570_v38 = vld [vmem:[%s886_s0 + $0x60] sm:$0xff]  }
  0x10   :  { %v231_v60 = vadd.f32 %v660_v7, %v160_v52  ;;  %v232_v61 = vadd.f32 %v660_v7, %v161_v53  ;;  %v233_v62 = vadd.f32 %v660_v7, %v162_v54  ;;  %v234_v63 = vadd.f32 %v660_v7, %v163_v55  ;;  %v571_v43 = vld [vmem:[%s886_s0 + $0x68] sm:$0xff]   ;;  %v572_v44 = vld [vmem:[%s886_s0 + $0x70] sm:$0xff]   ;;  %v573_v49 = vld [vmem:[%s886_s0 + $0x78] sm:$0xff]  }
  0x11   :  { %v293_v2 = vmax.f32 %v229_v56, 0.0  ;;  %v294_v3 = vmax.f32 %v230_v57, 0.0  ;;  %v235_v4 = vadd.f32 %v660_v7, %v164_v58  ;;  %v236_v5 = vadd.f32 %v660_v7, %v165_v59 }
  0x12   :  { %v295_v9 = vmax.f32 %v231_v60, 0.0  ;;  %v296_v10 = vmax.f32 %v232_v61, 0.0  ;;  %v297_v11 = vmax.f32 %v233_v62, 0.0  ;;  %v298_v12 = vmax.f32 %v234_v63, 0.0 }
  0x13   :  { %357 = vst [vmem:[#allocation2 + $0x40] sm:$0xff] %v293_v2  ;;  %358 = vst [vmem:[#allocation2 + $0x48] sm:$0xff] %v294_v3  ;;  %v299_v14 = vmax.f32 %v235_v4, 0.0  ;;  %v300_v15 = vmax.f32 %v236_v5, 0.0  ;;  %v465_v16 = vunpack.c.l.bf16 %v566_v0  ;;  %v466_v17 = vunpack.c.h.bf16 %v566_v0 }
  0x14   :  { %359 = vst [vmem:[#allocation2 + $0x50] sm:$0xff] %v295_v9  ;;  %360 = vst [vmem:[#allocation2 + $0x58] sm:$0xff] %v296_v10  ;;  %v469_v18 = vunpack.c.l.bf16 %v567_v6  ;;  %v470_v19 = vunpack.c.h.bf16 %v567_v6  ;;  %v473_v20 = vunpack.c.l.bf16 %v568_v8  ;;  %v474_v21 = vunpack.c.h.bf16 %v568_v8 }
  0x15   :  { %361 = vst [vmem:[#allocation2 + $0x60] sm:$0xff] %v297_v11  ;;  %362 = vst [vmem:[#allocation2 + $0x68] sm:$0xff] %v298_v12  ;;  %v166_v22 = vmul.f32 %v465_v16, %v646_v1  ;;  %v167_v23 = vmul.f32 %v466_v17, %v646_v1  ;;  %v477_v24 = vunpack.c.l.bf16 %v569_v13  ;;  %v478_v25 = vunpack.c.h.bf16 %v569_v13  ;;  %v574_v12 = vld [vmem:[%s886_s0 + $0x80] sm:$0xff]   ;;  %v575_v17 = vld [vmem:[%s886_s0 + $0x88] sm:$0xff]  }
  0x16   :  { %363 = vst [vmem:[#allocation2 + $0x70] sm:$0xff] %v299_v14  ;;  %364 = vst [vmem:[#allocation2 + $0x78] sm:$0xff] %v300_v15  ;;  %v168_v26 = vmul.f32 %v469_v18, %v646_v1  ;;  %v169_v27 = vmul.f32 %v470_v19, %v646_v1  ;;  %v170_v28 = vmul.f32 %v473_v20, %v646_v1  ;;  %v481_v52 = vunpack.c.l.bf16 %v570_v38  ;;  %v576_v18 = vld [vmem:[%s886_s0 + $0x90] sm:$0xff]  }
  0x17   :  { %v171_v29 = vmul.f32 %v474_v21, %v646_v1  ;;  %v237_v30 = vadd.f32 %v660_v7, %v166_v22  ;;  %v238_v31 = vadd.f32 %v660_v7, %v167_v23  ;;  %v172_v32 = vmul.f32 %v477_v24, %v646_v1  ;;  %v577_v23 = vld [vmem:[%s886_s0 + $0x98] sm:$0xff]  }
  0x18   :  { %v173_v33 = vmul.f32 %v478_v25, %v646_v1  ;;  %v239_v34 = vadd.f32 %v660_v7, %v168_v26  ;;  %v240_v35 = vadd.f32 %v660_v7, %v169_v27  ;;  %v241_v36 = vadd.f32 %v660_v7, %v170_v28 }
  0x19   :  { %v242_v37 = vadd.f32 %v660_v7, %v171_v29  ;;  %v301_v39 = vmax.f32 %v237_v30, 0.0  ;;  %v302_v40 = vmax.f32 %v238_v31, 0.0  ;;  %v243_v41 = vadd.f32 %v660_v7, %v172_v32 }
  0x1a   :  { %v244_v42 = vadd.f32 %v660_v7, %v173_v33  ;;  %v303_v45 = vmax.f32 %v239_v34, 0.0  ;;  %v304_v46 = vmax.f32 %v240_v35, 0.0  ;;  %v305_v47 = vmax.f32 %v241_v36, 0.0 }
  0x1b   :  { %v306_v48 = vmax.f32 %v242_v37, 0.0  ;;  %365 = vst [vmem:[#allocation2 + $0x80] sm:$0xff] %v301_v39  ;;  %366 = vst [vmem:[#allocation2 + $0x88] sm:$0xff] %v302_v40  ;;  %v307_v50 = vmax.f32 %v243_v41, 0.0  ;;  %v482_v53 = vunpack.c.h.bf16 %v570_v38  ;;  %v485_v54 = vunpack.c.l.bf16 %v571_v43 }
  0x1c   :  { %v308_v51 = vmax.f32 %v244_v42, 0.0  ;;  %367 = vst [vmem:[#allocation2 + $0x90] sm:$0xff] %v303_v45  ;;  %368 = vst [vmem:[#allocation2 + $0x98] sm:$0xff] %v304_v46  ;;  %v486_v55 = vunpack.c.h.bf16 %v571_v43  ;;  %v489_v56 = vunpack.c.l.bf16 %v572_v44  ;;  %v490_v57 = vunpack.c.h.bf16 %v572_v44 }
  0x1d   :  { %369 = vst [vmem:[#allocation2 + $0xa0] sm:$0xff] %v305_v47  ;;  %370 = vst [vmem:[#allocation2 + $0xa8] sm:$0xff] %v306_v48  ;;  %v174_v58 = vmul.f32 %v481_v52, %v646_v1  ;;  %v175_v59 = vmul.f32 %v482_v53, %v646_v1  ;;  %v493_v60 = vunpack.c.l.bf16 %v573_v49  ;;  %v494_v61 = vunpack.c.h.bf16 %v573_v49  ;;  %v578_v48 = vld [vmem:[%s886_s0 + $0xa0] sm:$0xff]   ;;  %v579_v53 = vld [vmem:[%s886_s0 + $0xa8] sm:$0xff]  }
  0x1e   :  { %371 = vst [vmem:[#allocation2 + $0xb0] sm:$0xff] %v307_v50  ;;  %372 = vst [vmem:[#allocation2 + $0xb8] sm:$0xff] %v308_v51  ;;  %v176_v62 = vmul.f32 %v485_v54, %v646_v1  ;;  %v177_v63 = vmul.f32 %v486_v55, %v646_v1  ;;  %v178_v0 = vmul.f32 %v489_v56, %v646_v1  ;;  %v497_v26 = vunpack.c.l.bf16 %v574_v12  ;;  %v580_v54 = vld [vmem:[%s886_s0 + $0xb0] sm:$0xff]  }
  0x1f   :  { %v179_v2 = vmul.f32 %v490_v57, %v646_v1  ;;  %v245_v3 = vadd.f32 %v660_v7, %v174_v58  ;;  %v246_v4 = vadd.f32 %v660_v7, %v175_v59  ;;  %v180_v5 = vmul.f32 %v493_v60, %v646_v1  ;;  %v581_v59 = vld [vmem:[%s886_s0 + $0xb8] sm:$0xff]  }
  0x20   :  { %v181_v6 = vmul.f32 %v494_v61, %v646_v1  ;;  %v247_v8 = vadd.f32 %v660_v7, %v176_v62  ;;  %v248_v9 = vadd.f32 %v660_v7, %v177_v63  ;;  %v249_v10 = vadd.f32 %v660_v7, %v178_v0 }
  0x21   :  { %v250_v11 = vadd.f32 %v660_v7, %v179_v2  ;;  %v309_v13 = vmax.f32 %v245_v3, 0.0  ;;  %v310_v14 = vmax.f32 %v246_v4, 0.0  ;;  %v251_v15 = vadd.f32 %v660_v7, %v180_v5 }
  0x22   :  { %v252_v16 = vadd.f32 %v660_v7, %v181_v6  ;;  %v311_v19 = vmax.f32 %v247_v8, 0.0  ;;  %v312_v20 = vmax.f32 %v248_v9, 0.0  ;;  %v313_v21 = vmax.f32 %v249_v10, 0.0 }
  0x23   :  { %v314_v22 = vmax.f32 %v250_v11, 0.0  ;;  %373 = vst [vmem:[#allocation2 + $0xc0] sm:$0xff] %v309_v13  ;;  %374 = vst [vmem:[#allocation2 + $0xc8] sm:$0xff] %v310_v14  ;;  %v315_v24 = vmax.f32 %v251_v15, 0.0  ;;  %v498_v27 = vunpack.c.h.bf16 %v574_v12  ;;  %v501_v28 = vunpack.c.l.bf16 %v575_v17 }
  0x24   :  { %v316_v25 = vmax.f32 %v252_v16, 0.0  ;;  %375 = vst [vmem:[#allocation2 + $0xd0] sm:$0xff] %v311_v19  ;;  %376 = vst [vmem:[#allocation2 + $0xd8] sm:$0xff] %v312_v20  ;;  %v502_v29 = vunpack.c.h.bf16 %v575_v17  ;;  %v505_v30 = vunpack.c.l.bf16 %v576_v18  ;;  %v506_v31 = vunpack.c.h.bf16 %v576_v18 }
  0x25   :  { %377 = vst [vmem:[#allocation2 + $0xe0] sm:$0xff] %v313_v21  ;;  %378 = vst [vmem:[#allocation2 + $0xe8] sm:$0xff] %v314_v22  ;;  %v182_v32 = vmul.f32 %v497_v26, %v646_v1  ;;  %v183_v33 = vmul.f32 %v498_v27, %v646_v1  ;;  %v509_v34 = vunpack.c.l.bf16 %v577_v23  ;;  %v510_v35 = vunpack.c.h.bf16 %v577_v23  ;;  %v582_v22 = vld [vmem:[%s886_s0 + $0xc0] sm:$0xff]   ;;  %v583_v27 = vld [vmem:[%s886_s0 + $0xc8] sm:$0xff]  }
  0x26   :  { %379 = vst [vmem:[#allocation2 + $0xf0] sm:$0xff] %v315_v24  ;;  %380 = vst [vmem:[#allocation2 + $0xf8] sm:$0xff] %v316_v25  ;;  %v184_v36 = vmul.f32 %v501_v28, %v646_v1  ;;  %v185_v37 = vmul.f32 %v502_v29, %v646_v1  ;;  %v186_v38 = vmul.f32 %v505_v30, %v646_v1  ;;  %v513_v62 = vunpack.c.l.bf16 %v578_v48  ;;  %v584_v28 = vld [vmem:[%s886_s0 + $0xd0] sm:$0xff]  }
  0x27   :  { %v187_v39 = vmul.f32 %v506_v31, %v646_v1  ;;  %v253_v40 = vadd.f32 %v660_v7, %v182_v32  ;;  %v254_v41 = vadd.f32 %v660_v7, %v183_v33  ;;  %v188_v42 = vmul.f32 %v509_v34, %v646_v1  ;;  %v585_v33 = vld [vmem:[%s886_s0 + $0xd8] sm:$0xff]  }
  0x28   :  { %v189_v43 = vmul.f32 %v510_v35, %v646_v1  ;;  %v255_v44 = vadd.f32 %v660_v7, %v184_v36  ;;  %v256_v45 = vadd.f32 %v660_v7, %v185_v37  ;;  %v257_v46 = vadd.f32 %v660_v7, %v186_v38 }
  0x29   :  { %v258_v47 = vadd.f32 %v660_v7, %v187_v39  ;;  %v317_v49 = vmax.f32 %v253_v40, 0.0  ;;  %v318_v50 = vmax.f32 %v254_v41, 0.0  ;;  %v259_v51 = vadd.f32 %v660_v7, %v188_v42 }
  0x2a   :  { %v260_v52 = vadd.f32 %v660_v7, %v189_v43  ;;  %v319_v55 = vmax.f32 %v255_v44, 0.0  ;;  %v320_v56 = vmax.f32 %v256_v45, 0.0  ;;  %v321_v57 = vmax.f32 %v257_v46, 0.0 }
  0x2b   :  { %v322_v58 = vmax.f32 %v258_v47, 0.0  ;;  %381 = vst [vmem:[#allocation2 + $0x100] sm:$0xff] %v317_v49  ;;  %382 = vst [vmem:[#allocation2 + $0x108] sm:$0xff] %v318_v50  ;;  %v323_v60 = vmax.f32 %v259_v51, 0.0  ;;  %v514_v63 = vunpack.c.h.bf16 %v578_v48  ;;  %v517_v0 = vunpack.c.l.bf16 %v579_v53 }
  0x2c   :  { %v324_v61 = vmax.f32 %v260_v52, 0.0  ;;  %383 = vst [vmem:[#allocation2 + $0x110] sm:$0xff] %v319_v55  ;;  %384 = vst [vmem:[#allocation2 + $0x118] sm:$0xff] %v320_v56  ;;  %v518_v2 = vunpack.c.h.bf16 %v579_v53  ;;  %v521_v3 = vunpack.c.l.bf16 %v580_v54  ;;  %v522_v4 = vunpack.c.h.bf16 %v580_v54 }
  0x2d   :  { %385 = vst [vmem:[#allocation2 + $0x120] sm:$0xff] %v321_v57  ;;  %386 = vst [vmem:[#allocation2 + $0x128] sm:$0xff] %v322_v58  ;;  %v190_v5 = vmul.f32 %v513_v62, %v646_v1  ;;  %v191_v6 = vmul.f32 %v514_v63, %v646_v1  ;;  %v525_v8 = vunpack.c.l.bf16 %v581_v59  ;;  %v526_v9 = vunpack.c.h.bf16 %v581_v59  ;;  %v586_v58 = vld [vmem:[%s886_s0 + $0xe0] sm:$0xff]   ;;  %v587_v63 = vld [vmem:[%s886_s0 + $0xe8] sm:$0xff]  }
  0x2e   :  { %387 = vst [vmem:[#allocation2 + $0x130] sm:$0xff] %v323_v60  ;;  %388 = vst [vmem:[#allocation2 + $0x138] sm:$0xff] %v324_v61  ;;  %v192_v10 = vmul.f32 %v517_v0, %v646_v1  ;;  %v193_v11 = vmul.f32 %v518_v2, %v646_v1  ;;  %v194_v12 = vmul.f32 %v521_v3, %v646_v1  ;;  %v529_v36 = vunpack.c.l.bf16 %v582_v22  ;;  %v588_v0 = vld [vmem:[%s886_s0 + $0xf0] sm:$0xff]  }
  0x2f   :  { %v195_v13 = vmul.f32 %v522_v4, %v646_v1  ;;  %v261_v14 = vadd.f32 %v660_v7, %v190_v5  ;;  %v262_v15 = vadd.f32 %v660_v7, %v191_v6  ;;  %v196_v16 = vmul.f32 %v525_v8, %v646_v1  ;;  %v589_v6 = vld [vmem:[%s886_s0 + $0xf8] sm:$0xff]   ;;  %s617_s0 = smov [#allocation2]  }
  0x30   :  { %v197_v17 = vmul.f32 %v526_v9, %v646_v1  ;;  %v263_v18 = vadd.f32 %v660_v7, %v192_v10  ;;  %v264_v19 = vadd.f32 %v660_v7, %v193_v11  ;;  %v265_v20 = vadd.f32 %v660_v7, %v194_v12  ;;  %s418_s22 = sshll.u32 %s617_s0, 4  ;;  %s419_s22 = int_to_ptr.vmem [resolvable:$true] %s418_s22 }
  0x31   :  { %v266_v21 = vadd.f32 %v660_v7, %v195_v13  ;;  %v325_v23 = vmax.f32 %v261_v14, 0.0  ;;  %v326_v24 = vmax.f32 %v262_v15, 0.0  ;;  %v267_v25 = vadd.f32 %v660_v7, %v196_v16  ;;  %s593_s23 = scalar_lea.vmem %s419_s22, 8192  ;;  %p598_p1 = scmp.lt.s32.totalorder %s419_s22, %s419_s22 }
  0x32   :  { %v268_v26 = vadd.f32 %v660_v7, %v197_v17  ;;  %v327_v29 = vmax.f32 %v263_v18, 0.0  ;;  %v328_v30 = vmax.f32 %v264_v19, 0.0  ;;  %v329_v31 = vmax.f32 %v265_v20, 0.0  ;;  %p594_p0 = scmp.ne.s32.totalorder %s419_s22, %s593_s23  ;;  %p599_p2 = scmp.lt.s32.totalorder %s593_s23, %s593_s23 }
  0x33   :  { %v330_v32 = vmax.f32 %v266_v21, 0.0  ;;  %389 = vst [vmem:[#allocation2 + $0x140] sm:$0xff] %v325_v23  ;;  %390 = vst [vmem:[#allocation2 + $0x148] sm:$0xff] %v326_v24  ;;  %v331_v34 = vmax.f32 %v267_v25, 0.0  ;;  %v530_v37 = vunpack.c.h.bf16 %v582_v22  ;;  %v533_v38 = vunpack.c.l.bf16 %v583_v27 }
  0x34   :  { %v332_v35 = vmax.f32 %v268_v26, 0.0  ;;  %391 = vst [vmem:[#allocation2 + $0x150] sm:$0xff] %v327_v29  ;;  %392 = vst [vmem:[#allocation2 + $0x158] sm:$0xff] %v328_v30  ;;  %v534_v39 = vunpack.c.h.bf16 %v583_v27  ;;  %v537_v40 = vunpack.c.l.bf16 %v584_v28  ;;  %v538_v41 = vunpack.c.h.bf16 %v584_v28  ;;  %p600_p3 = por %p599_p2, %p598_p1 }
  0x35   :  { %393 = vst [vmem:[#allocation2 + $0x160] sm:$0xff] %v329_v31  ;;  %394 = vst [vmem:[#allocation2 + $0x168] sm:$0xff] %v330_v32  ;;  %v198_v42 = vmul.f32 %v529_v36, %v646_v1  ;;  %v199_v43 = vmul.f32 %v530_v37, %v646_v1  ;;  %v541_v44 = vunpack.c.l.bf16 %v585_v33  ;;  %v542_v45 = vunpack.c.h.bf16 %v585_v33 }
  0x36   :  { %395 = vst [vmem:[#allocation2 + $0x170] sm:$0xff] %v331_v34  ;;  %396 = vst [vmem:[#allocation2 + $0x178] sm:$0xff] %v332_v35  ;;  %v200_v46 = vmul.f32 %v533_v38, %v646_v1  ;;  %v201_v47 = vmul.f32 %v534_v39, %v646_v1  ;;  %v202_v48 = vmul.f32 %v537_v40, %v646_v1  ;;  %v545_v10 = vunpack.c.l.bf16 %v586_v58  ;;  %p601_p4 = pnand %p600_p3, %p594_p0 }
  0x37   :  { %v203_v49 = vmul.f32 %v538_v41, %v646_v1  ;;  %v269_v50 = vadd.f32 %v660_v7, %v198_v42  ;;  %v270_v51 = vadd.f32 %v660_v7, %v199_v43  ;;  %v204_v52 = vmul.f32 %v541_v44, %v646_v1 }
  0x38   :  { %v205_v53 = vmul.f32 %v542_v45, %v646_v1  ;;  %v271_v54 = vadd.f32 %v660_v7, %v200_v46  ;;  %v272_v55 = vadd.f32 %v660_v7, %v201_v47  ;;  %v273_v56 = vadd.f32 %v660_v7, %v202_v48 }
  0x39   :  { %v274_v57 = vadd.f32 %v660_v7, %v203_v49  ;;  %v333_v59 = vmax.f32 %v269_v50, 0.0  ;;  %v334_v60 = vmax.f32 %v270_v51, 0.0  ;;  %v275_v61 = vadd.f32 %v660_v7, %v204_v52 }
  0x3a   :  { %v276_v62 = vadd.f32 %v660_v7, %v205_v53  ;;  %v335_v2 = vmax.f32 %v271_v54, 0.0  ;;  %v336_v3 = vmax.f32 %v272_v55, 0.0  ;;  %v337_v4 = vmax.f32 %v273_v56, 0.0 }
  0x3b   :  { %v338_v5 = vmax.f32 %v274_v57, 0.0  ;;  %397 = vst [vmem:[#allocation2 + $0x180] sm:$0xff] %v333_v59  ;;  %398 = vst [vmem:[#allocation2 + $0x188] sm:$0xff] %v334_v60  ;;  %v339_v8 = vmax.f32 %v275_v61, 0.0  ;;  %v546_v11 = vunpack.c.h.bf16 %v586_v58  ;;  %v549_v12 = vunpack.c.l.bf16 %v587_v63 }
  0x3c   :  { %v340_v9 = vmax.f32 %v276_v62, 0.0  ;;  %399 = vst [vmem:[#allocation2 + $0x190] sm:$0xff] %v335_v2  ;;  %400 = vst [vmem:[#allocation2 + $0x198] sm:$0xff] %v336_v3  ;;  %v550_v13 = vunpack.c.h.bf16 %v587_v63  ;;  %v553_v14 = vunpack.c.l.bf16 %v588_v0  ;;  %v554_v15 = vunpack.c.h.bf16 %v588_v0 }
  0x3d   :  { %401 = vst [vmem:[#allocation2 + $0x1a0] sm:$0xff] %v337_v4  ;;  %402 = vst [vmem:[#allocation2 + $0x1a8] sm:$0xff] %v338_v5  ;;  %v206_v16 = vmul.f32 %v545_v10, %v646_v1  ;;  %v207_v17 = vmul.f32 %v546_v11, %v646_v1  ;;  %v557_v18 = vunpack.c.l.bf16 %v589_v6  ;;  %v558_v19 = vunpack.c.h.bf16 %v589_v6 }
  0x3e   :  { %403 = vst [vmem:[#allocation2 + $0x1b0] sm:$0xff] %v339_v8  ;;  %404 = vst [vmem:[#allocation2 + $0x1b8] sm:$0xff] %v340_v9  ;;  %v208_v20 = vmul.f32 %v549_v12, %v646_v1  ;;  %v209_v21 = vmul.f32 %v550_v13, %v646_v1  ;;  %v210_v22 = vmul.f32 %v553_v14, %v646_v1 }
  0x3f   :  { %v211_v23 = vmul.f32 %v554_v15, %v646_v1  ;;  %v277_v24 = vadd.f32 %v660_v7, %v206_v16  ;;  %v278_v25 = vadd.f32 %v660_v7, %v207_v17  ;;  %v212_v26 = vmul.f32 %v557_v18, %v646_v1 }
  0x40   :  { %v213_v27 = vmul.f32 %v558_v19, %v646_v1  ;;  %v279_v28 = vadd.f32 %v660_v7, %v208_v20  ;;  %v280_v29 = vadd.f32 %v660_v7, %v209_v21  ;;  %v281_v30 = vadd.f32 %v660_v7, %v210_v22 }
  0x41   :  { %v282_v31 = vadd.f32 %v660_v7, %v211_v23  ;;  %v341_v32 = vmax.f32 %v277_v24, 0.0  ;;  %v342_v33 = vmax.f32 %v278_v25, 0.0  ;;  %v283_v34 = vadd.f32 %v660_v7, %v212_v26 }
  0x42   :  { %v284_v35 = vadd.f32 %v660_v7, %v213_v27  ;;  %v343_v36 = vmax.f32 %v279_v28, 0.0  ;;  %v344_v37 = vmax.f32 %v280_v29, 0.0  ;;  %v345_v38 = vmax.f32 %v281_v30, 0.0 }
  0x43   :  { %v346_v1 = vmax.f32 %v282_v31, 0.0  ;;  %405 = vst [vmem:[#allocation2 + $0x1c0] sm:$0xff] %v341_v32  ;;  %406 = vst [vmem:[#allocation2 + $0x1c8] sm:$0xff] %v342_v33  ;;  %v347_v39 = vmax.f32 %v283_v34, 0.0 }
  0x44   :  { %v348_v40 = vmax.f32 %v284_v35, 0.0  ;;  %407 = vst [vmem:[#allocation2 + $0x1d0] sm:$0xff] %v343_v36  ;;  %408 = vst [vmem:[#allocation2 + $0x1d8] sm:$0xff] %v344_v37 }
  0x45   :  { %409 = vst [vmem:[#allocation2 + $0x1e0] sm:$0xff] %v345_v38  ;;  %410 = vst [vmem:[#allocation2 + $0x1e8] sm:$0xff] %v346_v1 }
  0x46   :  { %411 = vst [vmem:[#allocation2 + $0x1f0] sm:$0xff] %v347_v39  ;;  %412 = vst [vmem:[#allocation2 + $0x1f8] sm:$0xff] %v348_v40 }
  0x47   :  { %604 = shalt.err (!%p601_p4)
}
  0x48   :  { %s605_s24 = scalar_lea.hbm %s889_s3, 8192 }
  0x49   :  { %p606_p5 = scmp.ne.s32.totalorder %s889_s3, %s605_s24  ;;  %p609_p6 = scmp.lt.u32.totalorder %s605_s24, %s889_s3 }
  0x4b   :  { %p611_p7 = pnand %p609_p6, %p606_p5 }
  0x4d   :  { %614 = shalt.err (!%p611_p7)
}
  0x4e   :  { %s618_s29 = smov 128   ;;  %s619_s30 = smov 8  }
  0x4f   :  { %424 = dma.vmem_to_hbm [thread:$0]  %s419_s22, 8192, %s889_s3, [#allocation3], %s618_s29, %s618_s29, %s619_s30  }
  0x50   :  { %615 = dma.done.wait [#allocation3], 8192  }
  0x51   :  { %616 = vsyncadd [#allocation3], 4294959104 }
  0x52   :  { %428 = vsyncpa [#allocation3], 1 }

// kernel: conv_batch_block_forward.2
= control target key start
LH: loop header
LB: loop body
LE: loop exit
PB: predicated region body
PF: predicated region fallthrough
CT: control target
= control target key end

     0   :  { %s2345_s12 = smov 0   ;;  %s2347_s13 = smov 0   ;;  %s2530_s0 = inlined_call_operand.vmem [shape: bf16[2,18,16,12], index: 0, kind: input, shape index: {}]   ;;  %s2531_s1 = inlined_call_operand.vmem [shape: bf16[3,12,128], index: 1, kind: input, shape index: {}]   ;;  %s2532_s2 = inlined_call_operand.vmem [shape: bf16[2,16,16,128], index: 2, kind: output, shape index: {0}]   ;;  %s2533_s3 = inlined_call_operand.vmem [shape: f32[2,1,2,128], index: 3, kind: output, shape index: {1}]  }
   0x1   :  { %s2349_s14 = smov 0  }
   0x2 LB: > { %s26_s15 = sadd.s32 1, %s2319_s13  ;;  %p1668_p0 = scmp.ge.s32.totalorder %s2323_s14, 1  ;;  %s2323_s14 = sphi %s2349_s14, %s14_s14   ;;  %s2319_s13 = sphi %s2347_s13, %s2535_s13   ;;  %s2315_s12 = sphi %s2345_s12, %s2534_s12  }
   0x3   : > { %p28_p1 = scmp.ge.s32.totalorder %s26_s15, 2  ;;  %p156_p2 = scmp.lt.s32.totalorder %s2323_s14, 3 }
   0x5   : > { %s2537_s15 = smov (%p28_p1, %s26_s15), 0  ;;  %p157_p3 = pnand %p1668_p0, %p156_p2 }
   0x6   : > { %v2250_v0 = vld [vmem:[%s2531_s1 + $0x8] sm:$0x3f] (!%p157_p3)   ;;  %vm427_vm0 = vcmask (!%p157_p3), 1045504   ;;  %p192_p4 = scmp.lt.s32.totalorder (!%p157_p3), %s2315_s12, 1  ;;  %v2251_v1 = vld [vmem:[%s2531_s1] sm:$0x3f] (!%p157_p3)  }
   0x7   : > { %160 = sbr.rel (%p157_p3) target bundleno = 347 (0x15b), region = 28  ;;  %2221 = vmatprep.subr.msk.bf16.mxu1 (!%p157_p3), %vm427_vm0, %v2250_v0  ;;  %v429_v2 = vsel (!%p157_p3), %vm427_vm0, %v2250_v0, 0  ;;  %v2254_v3 = vld [vmem:[%s2531_s1 + $0x10] sm:$0x3f] (!%p157_p3)   ;;  %2222 = vmatprep.subr.msk.bf16.mxu0 (!%p157_p3), %vm427_vm0, %v2251_v1  ;;  %v726_v4 = vsel (!%p157_p3), %vm427_vm0, %v2251_v1, 0  ;;  %vm378_vm1 = vcmask (!%p157_p3), 97280  }
   0x8   : > { %2054 = vmatpush3.bf16.msra.mxu1 (!%p157_p3), %v429_v2  ;;  %2088 = vmatpush3.bf16.msra.mxu0 (!%p157_p3), %v726_v4  ;;  %v1062_v9 = vsel (!%p157_p3), %vm427_vm0, %v2254_v3, 0  ;;  %vm1523_vm2 = vcmask (!%p157_p3), 1040384  }
   0x9   : > { %2223 = vmatprep.subr.msk.bf16.mxu1 (!%p157_p3), %vm427_vm0, %v2251_v1  ;;  %2224 = vmatprep.subr.msk.bf16.mxu0 (!%p157_p3), %vm427_vm0, %v2254_v3 }
   0xe   : > { %s2539_s12 = smov (!%p192_p4, %s2315_s12), 1 }
   0xf   : > { %s2225_s22 = smul.u32 144, %s2539_s12  ;;  %s1874_s26 = sshll.u32 %s2539_s12, 7 }
  0x10   : > { %s2495_s29 = scalar_lea.vmem %s2532_s2, %s1874_s26  ;;  %s1672_s30 = sshll.u32 %s2539_s12, 1 }
  0x11   : > { %s2384_s25 = scalar_lea.vmem %s2530_s0, %s2225_s22  ;;  %s214_s6 = scalar_lea.vmem %s2533_s3, %s1672_s30 }
  0x12   : > { %v2252_v5 = vld [vmem:[%s2384_s25 + $0x8] sm:$0xff]   ;;  %v2253_v6 = vld [vmem:[%s2384_s25] sm:$0xff]   ;;  %v2255_v7 = vld [vmem:[%s2384_s25 + $0x10] sm:$0xff]  }
  0x13   : > { %2055 = vmatprep.mubr.msk.bf16.mxu1 %vm378_vm1, %v2252_v5  ;;  %2089 = vmatprep.mubr.msk.bf16.mxu0 %vm378_vm1, %v2253_v6  ;;  %v2256_v8 = vld [vmem:[%s2384_s25 + $0x8] sm:$0xff]   ;;  %v2257_v10 = vld [vmem:[%s2384_s25 + $0x18] sm:$0xff]   ;;  %v2258_v11 = vld [vmem:[%s2384_s25 + $0x10] sm:$0xff]  }
  0x14   : > { %2056 = vmatmul.mubr.msk.bf16.vlgmr.msra.gmra.mrb[0].mxu1 %vm378_vm1, %v2255_v7  ;;  %2090 = vmatmul.mubr.msk.bf16.vlgmr.msra.gmra.mrb[0].mxu0 %vm378_vm1, %v2256_v8  ;;  %v2259_v12 = vld [vmem:[%s2384_s25 + $0x20] sm:$0xff]   ;;  %v2260_v13 = vld [vmem:[%s2384_s25 + $0x18] sm:$0xff]   ;;  %v2261_v14 = vld [vmem:[%s2384_s25 + $0x28] sm:$0xff]  }
  0x15   : > { %2156 = vmatpush3.bf16.msra.mxu1 %v726_v4  ;;  %2122 = vmatpush3.bf16.msra.mxu0 %v1062_v9  ;;  %v2262_v15 = vld [vmem:[%s2384_s25 + $0x20] sm:$0xff]   ;;  %v2263_v16 = vld [vmem:[%s2384_s25 + $0x30] sm:$0xff]   ;;  %v2264_v17 = vld [vmem:[%s2384_s25 + $0x28] sm:$0xff]  }
  0x16   : > { %2059 = vmatprep.mubr.msk.bf16.mxu1 %vm378_vm1, %v2257_v10  ;;  %2093 = vmatprep.mubr.msk.bf16.mxu0 %vm378_vm1, %v2258_v11  ;;  %v2265_v18 = vld [vmem:[%s2384_s25 + $0x38] sm:$0xff]   ;;  %v2266_v19 = vld [vmem:[%s2384_s25 + $0x30] sm:$0xff]   ;;  %v2267_v20 = vld [vmem:[%s2384_s25 + $0x40] sm:$0xff]  }
  0x17   : > { %v2268_v21 = vld [vmem:[%s2384_s25 + $0x38] sm:$0xff]   ;;  %v2269_v22 = vld [vmem:[%s2384_s25 + $0x48] sm:$0xff]   ;;  %v2270_v23 = vld [vmem:[%s2384_s25 + $0x10] sm:$0xff]  }
  0x18   : > { %v2271_v24 = vld [vmem:[%s2384_s25 + $0x50] sm:$0xff]   ;;  %v2272_v25 = vld [vmem:[%s2384_s25 + $0x18] sm:$0xff]   ;;  %v2274_v27 = vld [vmem:[%s2384_s25 + $0x20] sm:$0xff]  }
  0x19   : > { %v2273_v26 = vld [vmem:[%s2384_s25 + $0x58] sm:$0xff]   ;;  %v2275_v28 = vld [vmem:[%s2384_s25 + $0x60] sm:$0xff]   ;;  %v2276_v29 = vld [vmem:[%s2384_s25 + $0x28] sm:$0xff]  }
  0x1a   : > { %v2277_v30 = vld [vmem:[%s2384_s25 + $0x68] sm:$0xff]   ;;  %v2278_v31 = vld [vmem:[%s2384_s25 + $0x30] sm:$0xff]   ;;  %v2280_v33 = vld [vmem:[%s2384_s25 + $0x38] sm:$0xff]  }
  0x1b   : > { %v2279_v32 = vld [vmem:[%s2384_s25 + $0x70] sm:$0xff]   ;;  %v2281_v34 = vld [vmem:[%s2384_s25 + $0x78] sm:$0xff]   ;;  %v2282_v35 = vld [vmem:[%s2384_s25 + $0x40] sm:$0xff]  }
  0x1c   : > { %2060 = vmatmul.mubr.msk.bf16.gmra.mrb[4].mxu1 %vm378_vm1, %v2259_v12  ;;  %2094 = vmatmul.mubr.msk.bf16.gmra.mrb[4].mxu0 %vm378_vm1, %v2260_v13  ;;  %v2283_v36 = vld [vmem:[%s2384_s25 + $0x80] sm:$0xff]   ;;  %v2284_v37 = vld [vmem:[%s2384_s25 + $0x48] sm:$0xff]   ;;  %v2286_v39 = vld [vmem:[%s2384_s25 + $0x50] sm:$0xff]  }
  0x1d   : > { %2063 = vmatprep.mubr.msk.bf16.mxu1 %vm378_vm1, %v2261_v14  ;;  %2097 = vmatprep.mubr.msk.bf16.mxu0 %vm378_vm1, %v2262_v15  ;;  %v2285_v38 = vld [vmem:[%s2384_s25 + $0x40] sm:$0xff]   ;;  %v2287_v40 = vld [vmem:[%s2384_s25 + $0x48] sm:$0xff]   ;;  %v2288_v41 = vld [vmem:[%s2384_s25 + $0x58] sm:$0xff]  }
  0x1e   : > { %v2289_v42 = vld [vmem:[%s2384_s25 + $0x50] sm:$0xff]   ;;  %v2290_v43 = vld [vmem:[%s2384_s25 + $0x60] sm:$0xff]   ;;  %v2291_v44 = vld [vmem:[%s2384_s25 + $0x58] sm:$0xff]  }
  0x1f   : > { %v2292_v45 = vld [vmem:[%s2384_s25 + $0x68] sm:$0xff]   ;;  %v2293_v46 = vld [vmem:[%s2384_s25 + $0x60] sm:$0xff]   ;;  %v2294_v47 = vld [vmem:[%s2384_s25 + $0x70] sm:$0xff]  }
  0x20   : > { %v2295_v48 = vld [vmem:[%s2384_s25 + $0x68] sm:$0xff]   ;;  %v2296_v49 = vld [vmem:[%s2384_s25 + $0x78] sm:$0xff]   ;;  %v2297_v50 = vld [vmem:[%s2384_s25 + $0x70] sm:$0xff]  }
  0x21   : > { %v2298_v51 = vld [vmem:[%s2384_s25 + $0x80] sm:$0xff]   ;;  %v2299_v52 = vld [vmem:[%s2384_s25 + $0x78] sm:$0xff]   ;;  %v2300_v53 = vld [vmem:[%s2384_s25 + $0x88] sm:$0xff]  }
  0x24   : > { %2064 = vmatmul.mubr.msk.bf16.gmra.mrb[8].mxu1 %vm378_vm1, %v2263_v16  ;;  %2098 = vmatmul.mubr.msk.bf16.gmra.mrb[8].mxu0 %vm378_vm1, %v2264_v17 }
  0x25   : > { %2067 = vmatprep.mubr.msk.bf16.mxu1 %vm378_vm1, %v2265_v18  ;;  %2101 = vmatprep.mubr.msk.bf16.mxu0 %vm378_vm1, %v2266_v19 }
  0x2c   : > { %2068 = vmatmul.mubr.msk.bf16.gmra.mrb[12].mxu1 %vm378_vm1, %v2267_v20  ;;  %2102 = vmatmul.mubr.msk.bf16.gmra.mrb[12].mxu0 %vm378_vm1, %v2268_v21 }
  0x2d   : > { %2071 = vmatprep.mubr.msk.bf16.mxu1 %vm378_vm1, %v2269_v22  ;;  %2123 = vmatprep.mubr.msk.bf16.mxu0 %vm378_vm1, %v2270_v23 }
  0x34   : > { %2072 = vmatmul.mubr.msk.bf16.gmra.mrb[16].mxu1 %vm378_vm1, %v2271_v24  ;;  %2124 = vmatmul.mubr.msk.bf16.vlgmr.msra.gmra.mrb[0].mxu0 %vm378_vm1, %v2272_v25 }
  0x35   : > { %2075 = vmatprep.mubr.msk.bf16.mxu1 %vm378_vm1, %v2273_v26  ;;  %2127 = vmatprep.mubr.msk.bf16.mxu0 %vm378_vm1, %v2274_v27 }
  0x3c   : > { %2076 = vmatmul.mubr.msk.bf16.gmra.mrb[20].mxu1 %vm378_vm1, %v2275_v28  ;;  %2128 = vmatmul.mubr.msk.bf16.gmra.mrb[4].mxu0 %vm378_vm1, %v2276_v29 }
  0x3d   : > { %2079 = vmatprep.mubr.msk.bf16.mxu1 %vm378_vm1, %v2277_v30  ;;  %2131 = vmatprep.mubr.msk.bf16.mxu0 %vm378_vm1, %v2278_v31 }
  0x44   : > { %2080 = vmatmul.mubr.msk.bf16.gmra.mrb[24].mxu1 %vm378_vm1, %v2279_v32  ;;  %2132 = vmatmul.mubr.msk.bf16.gmra.mrb[8].mxu0 %vm378_vm1, %v2280_v33 }
  0x45   : > { %2083 = vmatprep.mubr.msk.bf16.mxu1 %vm378_vm1, %v2281_v34  ;;  %2135 = vmatprep.mubr.msk.bf16.mxu0 %vm378_vm1, %v2282_v35 }
  0x4c   : > { %2084 = vmatmul.mubr.msk.bf16.gmra.mrb[28].mxu1 %vm378_vm1, %v2283_v36  ;;  %2136 = vmatmul.mubr.msk.bf16.gmra.mrb[12].mxu0 %vm378_vm1, %v2284_v37 }
  0x4d   : > { %2105 = vmatprep.mubr.msk.bf16.mxu1 %vm378_vm1, %v2285_v38  ;;  %2139 = vmatprep.mubr.msk.bf16.mxu0 %vm378_vm1, %v2286_v39 }
  0x54   : > { %2106 = vmatmul.mubr.msk.bf16.vlgmr.msra.gmra.mrb[16].mxu1 %vm378_vm1, %v2287_v40  ;;  %2140 = vmatmul.mubr.msk.bf16.gmra.mrb[16].mxu0 %vm378_vm1, %v2288_v41 }
  0x55   : > { %2109 = vmatprep.mubr.msk.bf16.mxu1 %vm378_vm1, %v2289_v42  ;;  %2143 = vmatprep.mubr.msk.bf16.mxu0 %vm378_vm1, %v2290_v43 }
  0x5c   : > { %2110 = vmatmul.mubr.msk.bf16.gmra.mrb[20].mxu1 %vm378_vm1, %v2291_v44  ;;  %2144 = vmatmul.mubr.msk.bf16.gmra.mrb[20].mxu0 %vm378_vm1, %v2292_v45 }
  0x5d   : > { %2113 = vmatprep.mubr.msk.bf16.mxu1 %vm378_vm1, %v2293_v46  ;;  %2147 = vmatprep.mubr.msk.bf16.mxu0 %vm378_vm1, %v2294_v47 }
  0x64   : > { %2114 = vmatmul.mubr.msk.bf16.gmra.mrb[24].mxu1 %vm378_vm1, %v2295_v48  ;;  %2148 = vmatmul.mubr.msk.bf16.gmra.mrb[24].mxu0 %vm378_vm1, %v2296_v49 }
  0x65   : > { %2117 = vmatprep.mubr.msk.bf16.mxu1 %vm378_vm1, %v2297_v50  ;;  %2151 = vmatprep.mubr.msk.bf16.mxu0 %vm378_vm1, %v2298_v51 }
  0x6c   : > { %2118 = vmatmul.mubr.msk.bf16.gmra.mrb[28].mxu1 %vm378_vm1, %v2299_v52  ;;  %2152 = vmatmul.mubr.msk.bf16.gmra.mrb[28].mxu0 %vm378_vm1, %v2300_v53 }
  0xe7   : > { %v2057_v54 = vpop.f32.mrb[0].mxu1 }
  0xe8   : > { %v465_v55 = vpop.f32.mrb[1].mxu1 }
  0xe9   : > { %v2058_v56 = vpop.f32.mrb[2].mxu1 }
  0xea   : > { %v468_v57 = vpop.f32.mrb[3].mxu1 }
  0xef   : > { %v2061_v58 = vpop.f32.mrb[4].mxu1 }
  0xf0   : > { %v481_v59 = vpop.f32.mrb[5].mxu1 }
  0xf1   : > { %v2062_v60 = vpop.f32.mrb[6].mxu1 }
  0xf2   : > { %v484_v61 = vpop.f32.mrb[7].mxu1 }
  0xf7   : > { %v2065_v62 = vpop.f32.mrb[8].mxu1 }
  0xf8   : > { %v497_v63 = vpop.f32.mrb[9].mxu1 }
  0xf9   : > { %v2066_v0 = vpop.f32.mrb[10].mxu1 }
  0xfa   : > { %v500_v1 = vpop.f32.mrb[11].mxu1 }
  0xff   : > { %v2483_v2 = vpop.f32.mrb[12].mxu1 }
 0x100   : > { %v2485_v3 = vpop.f32.mrb[13].mxu1 }
 0x101   : > { %v2487_v4 = vpop.f32.mrb[14].mxu1 }
 0x102   : > { %v2489_v5 = vpop.f32.mrb[15].mxu1 }
 0x107   : > { %v2125_v6 = vpop.f32.mrb[0].mxu0 }
 0x108   : > { %v2157_v7 = vadd.f32 %v2125_v6, %v2057_v54  ;;  %v1098_v8 = vpop.f32.mrb[1].mxu0 }
 0x109   : > { %v2158_v9 = vadd.f32 %v1098_v8, %v465_v55  ;;  %v2126_v10 = vpop.f32.mrb[2].mxu0 }
 0x10a   : > { %v2159_v11 = vadd.f32 %v2126_v10, %v2058_v56  ;;  %v1101_v12 = vpop.f32.mrb[3].mxu0  ;;  %v1456_v19 = vmul.f32 %v2157_v7, %v2157_v7 }
 0x10b   : > { %v2160_v13 = vadd.f32 %v1101_v12, %v468_v57  ;;  %v1454_v15 = vmul.f32 %v2158_v9, %v2158_v9 }
 0x10c   : > { %v1915_v14 = vpack.c.bf16 %v2159_v11, %v2157_v7  ;;  %v1457_v25 = vmul.f32 %v2159_v11, %v2159_v11 }
 0x10d   : > { %v1910_v16 = vpack.c.bf16 %v2160_v13, %v2158_v9  ;;  %v1417_v17 = vadd.f32 %v2160_v13, %v2158_v9  ;;  %v1455_v18 = vmul.f32 %v2160_v13, %v2160_v13 }
 0x10e   : > { %1987 = vst [vmem:[%s2495_s29 + $0x8] sm:$0xff] %v1915_v14  }
 0x10f   : > { %1911 = vst [vmem:[%s2495_s29] sm:$0xff] %v1910_v16   ;;  %v1418_v20 = vadd.f32 %v2157_v7, %v1417_v17  ;;  %v1486_v21 = vadd.f32 %v1455_v18, %v1454_v15  ;;  %v2129_v22 = vpop.f32.mrb[4].mxu0 }
 0x110   : > { %v2161_v23 = vadd.f32 %v2129_v22, %v2061_v58  ;;  %v1114_v24 = vpop.f32.mrb[5].mxu0 }
 0x111   : > { %v1487_v26 = vadd.f32 %v1486_v21, %v1456_v19  ;;  %v2162_v27 = vadd.f32 %v1114_v24, %v481_v59  ;;  %v1419_v28 = vadd.f32 %v2159_v11, %v1418_v20  ;;  %v2130_v29 = vpop.f32.mrb[6].mxu0 }
 0x112   : > { %v2163_v30 = vadd.f32 %v2130_v29, %v2062_v60  ;;  %v1117_v31 = vpop.f32.mrb[7].mxu0  ;;  %v1460_v41 = vmul.f32 %v2161_v23, %v2161_v23 }
 0x113   : > { %v1420_v32 = vadd.f32 %v2162_v27, %v1419_v28  ;;  %v1458_v33 = vmul.f32 %v2162_v27, %v2162_v27  ;;  %v1488_v34 = vadd.f32 %v1487_v26, %v1457_v25  ;;  %v2164_v35 = vadd.f32 %v1117_v31, %v484_v61 }
 0x114   : > { %v1925_v36 = vpack.c.bf16 %v2163_v30, %v2161_v23  ;;  %v1461_v47 = vmul.f32 %v2163_v30, %v2163_v30 }
 0x115   : > { %v1489_v37 = vadd.f32 %v1488_v34, %v1458_v33  ;;  %v1920_v38 = vpack.c.bf16 %v2164_v35, %v2162_v27  ;;  %v1421_v39 = vadd.f32 %v2164_v35, %v1420_v32  ;;  %v1459_v40 = vmul.f32 %v2164_v35, %v2164_v35 }
 0x116   : > { %1989 = vst [vmem:[%s2495_s29 + $0x18] sm:$0xff] %v1925_v36  }
 0x117   : > { %1988 = vst [vmem:[%s2495_s29 + $0x10] sm:$0xff] %v1920_v38   ;;  %v1422_v42 = vadd.f32 %v2161_v23, %v1421_v39  ;;  %v1490_v43 = vadd.f32 %v1489_v37, %v1459_v40  ;;  %v2133_v44 = vpop.f32.mrb[8].mxu0 }
 0x118   : > { %v2165_v45 = vadd.f32 %v2133_v44, %v2065_v62  ;;  %v1130_v46 = vpop.f32.mrb[9].mxu0 }
 0x119   : > { %v1491_v48 = vadd.f32 %v1490_v43, %v1460_v41  ;;  %v2166_v49 = vadd.f32 %v1130_v46, %v497_v63  ;;  %v1423_v50 = vadd.f32 %v2163_v30, %v1422_v42  ;;  %v2134_v51 = vpop.f32.mrb[10].mxu0 }
 0x11a   : > { %v2167_v52 = vadd.f32 %v2134_v51, %v2066_v0  ;;  %v1133_v53 = vpop.f32.mrb[11].mxu0  ;;  %v1464_v62 = vmul.f32 %v2165_v45, %v2165_v45 }
 0x11b   : > { %v1424_v54 = vadd.f32 %v2166_v49, %v1423_v50  ;;  %v1462_v55 = vmul.f32 %v2166_v49, %v2166_v49  ;;  %v1492_v56 = vadd.f32 %v1491_v48, %v1461_v47  ;;  %v2168_v57 = vadd.f32 %v1133_v53, %v500_v1 }
 0x11c   : > { %v1935_v58 = vpack.c.bf16 %v2167_v52, %v2165_v45  ;;  %v1465_v0 = vmul.f32 %v2167_v52, %v2167_v52 }
 0x11d   : > { %v1493_v59 = vadd.f32 %v1492_v56, %v1462_v55  ;;  %v1930_v60 = vpack.c.bf16 %v2168_v57, %v2166_v49  ;;  %v1425_v61 = vadd.f32 %v2168_v57, %v1424_v54  ;;  %v1463_v6 = vmul.f32 %v2168_v57, %v2168_v57 }
 0x11e   : > { %1991 = vst [vmem:[%s2495_s29 + $0x28] sm:$0xff] %v1935_v58  }
 0x11f   : > { %1990 = vst [vmem:[%s2495_s29 + $0x20] sm:$0xff] %v1930_v60   ;;  %v1426_v7 = vadd.f32 %v2165_v45, %v1425_v61  ;;  %v1494_v8 = vadd.f32 %v1493_v59, %v1463_v6  ;;  %v2137_v63 = vpop.f32.mrb[12].mxu0 }
 0x120   : > { %v2169_v9 = vadd.f32 %v2137_v63, %v2483_v2  ;;  %v1146_v10 = vpop.f32.mrb[13].mxu0 }
 0x121   : > { %v1495_v11 = vadd.f32 %v1494_v8, %v1464_v62  ;;  %v2170_v12 = vadd.f32 %v1146_v10, %v2485_v3  ;;  %v1427_v1 = vadd.f32 %v2167_v52, %v1426_v7  ;;  %v2138_v13 = vpop.f32.mrb[14].mxu0 }
 0x122   : > { %v2171_v14 = vadd.f32 %v2138_v13, %v2487_v4  ;;  %v1149_v15 = vpop.f32.mrb[15].mxu0  ;;  %v1468_v25 = vmul.f32 %v2169_v9, %v2169_v9 }
 0x123   : > { %v1428_v16 = vadd.f32 %v2170_v12, %v1427_v1  ;;  %v1466_v17 = vmul.f32 %v2170_v12, %v2170_v12  ;;  %v1496_v18 = vadd.f32 %v1495_v11, %v1465_v0  ;;  %v2172_v19 = vadd.f32 %v1149_v15, %v2489_v5 }
 0x124   : > { %v1945_v20 = vpack.c.bf16 %v2171_v14, %v2169_v9  ;;  %v1469_v31 = vmul.f32 %v2171_v14, %v2171_v14 }
 0x125   : > { %v1497_v21 = vadd.f32 %v1496_v18, %v1466_v17  ;;  %v1940_v2 = vpack.c.bf16 %v2172_v19, %v2170_v12  ;;  %v1429_v22 = vadd.f32 %v2172_v19, %v1428_v16  ;;  %v1467_v23 = vmul.f32 %v2172_v19, %v2172_v19 }
 0x126   : > { %1993 = vst [vmem:[%s2495_s29 + $0x38] sm:$0xff] %v1945_v20  }
 0x127   : > { %v2107_v24 = vpop.f32.mrb[16].mxu1  ;;  %1992 = vst [vmem:[%s2495_s29 + $0x30] sm:$0xff] %v1940_v2   ;;  %v1430_v3 = vadd.f32 %v2169_v9, %v1429_v22  ;;  %v1498_v26 = vadd.f32 %v1497_v21, %v1467_v23  ;;  %v2141_v27 = vpop.f32.mrb[16].mxu0 }
 0x128   : > { %v826_v28 = vpop.f32.mrb[17].mxu1  ;;  %v2173_v4 = vadd.f32 %v2141_v27, %v2107_v24  ;;  %v1162_v29 = vpop.f32.mrb[17].mxu0 }
 0x129   : > { %v2108_v30 = vpop.f32.mrb[18].mxu1  ;;  %v1499_v32 = vadd.f32 %v1498_v26, %v1468_v25  ;;  %v2174_v5 = vadd.f32 %v1162_v29, %v826_v28  ;;  %v1431_v33 = vadd.f32 %v2171_v14, %v1430_v3  ;;  %v2142_v34 = vpop.f32.mrb[18].mxu0 }
 0x12a   : > { %v829_v35 = vpop.f32.mrb[19].mxu1  ;;  %v2175_v36 = vadd.f32 %v2142_v34, %v2108_v30  ;;  %v1165_v37 = vpop.f32.mrb[19].mxu0  ;;  %v1472_v48 = vmul.f32 %v2173_v4, %v2173_v4 }
 0x12b   : > { %v1432_v38 = vadd.f32 %v2174_v5, %v1431_v33  ;;  %v1470_v39 = vmul.f32 %v2174_v5, %v2174_v5  ;;  %v1500_v40 = vadd.f32 %v1499_v32, %v1469_v31  ;;  %v2176_v41 = vadd.f32 %v1165_v37, %v829_v35 }
 0x12c   : > { %v1955_v42 = vpack.c.bf16 %v2175_v36, %v2173_v4  ;;  %v1473_v56 = vmul.f32 %v2175_v36, %v2175_v36 }
 0x12d   : > { %v1501_v43 = vadd.f32 %v1500_v40, %v1470_v39  ;;  %v1950_v44 = vpack.c.bf16 %v2176_v41, %v2174_v5  ;;  %v1433_v45 = vadd.f32 %v2176_v41, %v1432_v38  ;;  %v1471_v46 = vmul.f32 %v2176_v41, %v2176_v41 }
 0x12e   : > { %1995 = vst [vmem:[%s2495_s29 + $0x48] sm:$0xff] %v1955_v42  }
 0x12f   : > { %v2111_v47 = vpop.f32.mrb[20].mxu1  ;;  %1994 = vst [vmem:[%s2495_s29 + $0x40] sm:$0xff] %v1950_v44   ;;  %v1434_v49 = vadd.f32 %v2173_v4, %v1433_v45  ;;  %v1502_v50 = vadd.f32 %v1501_v43, %v1471_v46  ;;  %v2145_v51 = vpop.f32.mrb[20].mxu0 }
 0x130   : > { %v842_v52 = vpop.f32.mrb[21].mxu1  ;;  %v2177_v53 = vadd.f32 %v2145_v51, %v2111_v47  ;;  %v1178_v54 = vpop.f32.mrb[21].mxu0 }
 0x131   : > { %v2112_v55 = vpop.f32.mrb[22].mxu1  ;;  %v1503_v57 = vadd.f32 %v1502_v50, %v1472_v48  ;;  %v2178_v58 = vadd.f32 %v1178_v54, %v842_v52  ;;  %v1435_v59 = vadd.f32 %v2175_v36, %v1434_v49  ;;  %v2146_v60 = vpop.f32.mrb[22].mxu0 }
 0x132   : > { %v845_v61 = vpop.f32.mrb[23].mxu1  ;;  %v2179_v6 = vadd.f32 %v2146_v60, %v2112_v55  ;;  %v1181_v62 = vpop.f32.mrb[23].mxu0  ;;  %v1476_v14 = vmul.f32 %v2177_v53, %v2177_v53 }
 0x133   : > { %v1436_v7 = vadd.f32 %v2178_v58, %v1435_v59  ;;  %v1474_v8 = vmul.f32 %v2178_v58, %v2178_v58  ;;  %v1504_v63 = vadd.f32 %v1503_v57, %v1473_v56  ;;  %v2180_v9 = vadd.f32 %v1181_v62, %v845_v61 }
 0x134   : > { %v1965_v10 = vpack.c.bf16 %v2179_v6, %v2177_v53  ;;  %v1477_v2 = vmul.f32 %v2179_v6, %v2179_v6 }
 0x135   : > { %v1505_v0 = vadd.f32 %v1504_v63, %v1474_v8  ;;  %v1960_v11 = vpack.c.bf16 %v2180_v9, %v2178_v58  ;;  %v1437_v12 = vadd.f32 %v2180_v9, %v1436_v7  ;;  %v1475_v1 = vmul.f32 %v2180_v9, %v2180_v9 }
 0x136   : > { %1997 = vst [vmem:[%s2495_s29 + $0x58] sm:$0xff] %v1965_v10  }
 0x137   : > { %v2115_v13 = vpop.f32.mrb[24].mxu1  ;;  %1996 = vst [vmem:[%s2495_s29 + $0x50] sm:$0xff] %v1960_v11   ;;  %v1438_v15 = vadd.f32 %v2177_v53, %v1437_v12  ;;  %v1506_v16 = vadd.f32 %v1505_v0, %v1475_v1  ;;  %v2149_v17 = vpop.f32.mrb[24].mxu0 }
 0x138   : > { %v858_v18 = vpop.f32.mrb[25].mxu1  ;;  %v2181_v19 = vadd.f32 %v2149_v17, %v2115_v13  ;;  %v1194_v20 = vpop.f32.mrb[25].mxu0 }
 0x139   : > { %v2116_v21 = vpop.f32.mrb[26].mxu1  ;;  %v1507_v22 = vadd.f32 %v1506_v16, %v1476_v14  ;;  %v2182_v23 = vadd.f32 %v1194_v20, %v858_v18  ;;  %v1439_v24 = vadd.f32 %v2179_v6, %v1438_v15  ;;  %v2150_v25 = vpop.f32.mrb[26].mxu0 }
 0x13a   : > { %v861_v3 = vpop.f32.mrb[27].mxu1  ;;  %v2183_v26 = vadd.f32 %v2150_v25, %v2116_v21  ;;  %v1197_v27 = vpop.f32.mrb[27].mxu0  ;;  %v1480_v36 = vmul.f32 %v2181_v19, %v2181_v19 }
 0x13b   : > { %v1440_v28 = vadd.f32 %v2182_v23, %v1439_v24  ;;  %v1478_v4 = vmul.f32 %v2182_v23, %v2182_v23  ;;  %v1508_v29 = vadd.f32 %v1507_v22, %v1477_v2  ;;  %v2184_v30 = vadd.f32 %v1197_v27, %v861_v3 }
 0x13c   : > { %v1975_v31 = vpack.c.bf16 %v2183_v26, %v2181_v19  ;;  %v1481_v44 = vmul.f32 %v2183_v26, %v2183_v26 }
 0x13d   : > { %v1509_v32 = vadd.f32 %v1508_v29, %v1478_v4  ;;  %v1970_v5 = vpack.c.bf16 %v2184_v30, %v2182_v23  ;;  %v1441_v33 = vadd.f32 %v2184_v30, %v1440_v28  ;;  %v1479_v34 = vmul.f32 %v2184_v30, %v2184_v30 }
 0x13e   : > { %1999 = vst [vmem:[%s2495_s29 + $0x68] sm:$0xff] %v1975_v31  }
 0x13f   : > { %v2119_v35 = vpop.f32.mrb[28].mxu1  ;;  %1998 = vst [vmem:[%s2495_s29 + $0x60] sm:$0xff] %v1970_v5   ;;  %v1442_v37 = vadd.f32 %v2181_v19, %v1441_v33  ;;  %v1510_v38 = vadd.f32 %v1509_v32, %v1479_v34  ;;  %v2153_v39 = vpop.f32.mrb[28].mxu0 }
 0x140   : > { %v874_v40 = vpop.f32.mrb[29].mxu1  ;;  %v2185_v41 = vadd.f32 %v2153_v39, %v2119_v35  ;;  %v1210_v42 = vpop.f32.mrb[29].mxu0 }
 0x141   : > { %v2120_v43 = vpop.f32.mrb[30].mxu1  ;;  %v1511_v45 = vadd.f32 %v1510_v38, %v1480_v36  ;;  %v2186_v46 = vadd.f32 %v1210_v42, %v874_v40  ;;  %v1443_v47 = vadd.f32 %v2183_v26, %v1442_v37  ;;  %v2154_v48 = vpop.f32.mrb[30].mxu0 }
 0x142   : > { %v877_v49 = vpop.f32.mrb[31].mxu1  ;;  %v2187_v50 = vadd.f32 %v2154_v48, %v2120_v43  ;;  %v1213_v51 = vpop.f32.mrb[31].mxu0  ;;  %v1484_v61 = vmul.f32 %v2185_v41, %v2185_v41 }
 0x143   : > { %v1444_v52 = vadd.f32 %v2186_v46, %v1443_v47  ;;  %v1482_v53 = vmul.f32 %v2186_v46, %v2186_v46  ;;  %v1512_v54 = vadd.f32 %v1511_v45, %v1481_v44  ;;  %v2188_v55 = vadd.f32 %v1213_v51, %v877_v49 }
 0x144   : > { %v1985_v56 = vpack.c.bf16 %v2187_v50, %v2185_v41  ;;  %v1485_v7 = vmul.f32 %v2187_v50, %v2187_v50 }
 0x145   : > { %v1513_v57 = vadd.f32 %v1512_v54, %v1482_v53  ;;  %v1980_v58 = vpack.c.bf16 %v2188_v55, %v2186_v46  ;;  %v1445_v59 = vadd.f32 %v2188_v55, %v1444_v52  ;;  %v1483_v60 = vmul.f32 %v2188_v55, %v2188_v55 }
 0x146   : > { %2001 = vst [vmem:[%s2495_s29 + $0x78] sm:$0xff] %v1985_v56  }
 0x147   : > { %2000 = vst [vmem:[%s2495_s29 + $0x70] sm:$0xff] %v1980_v58   ;;  %v1446_v6 = vadd.f32 %v2185_v41, %v1445_v59  ;;  %v1514_v62 = vadd.f32 %v1513_v57, %v1483_v60 }
 0x149   : > { %v1447_v8 = vadd.f32 %v2187_v50, %v1446_v6  ;;  %v1515_v63 = vadd.f32 %v1514_v62, %v1484_v61 }
 0x14b   : > { %v1448_v9 = vrot.slane %v1447_v8, 4  ;;  %v1516_v10 = vadd.f32 %v1515_v63, %v1485_v7 }
 0x14d   : > { %v1449_v0 = vadd.f32 %v1448_v9, %v1447_v8  ;;  %v1517_v11 = vrot.slane %v1516_v10, 4 }
 0x14f   : > { %v1450_v12 = vrot.slane %v1449_v0, 2  ;;  %v1518_v1 = vadd.f32 %v1517_v11, %v1516_v10 }
 0x151   : > { %v1451_v13 = vadd.f32 %v1450_v12, %v1449_v0  ;;  %v1519_v14 = vrot.slane %v1518_v1, 2 }
 0x153   : > { %v1452_v15 = vrot.slane %v1451_v13, 1  ;;  %v1520_v16 = vadd.f32 %v1519_v14, %v1518_v1 }
 0x155   : > { %v1521_v17 = vrot.slane %v1520_v16, 1  ;;  %v1453_v18 = vadd.f32 %v1452_v15, %v1451_v13 }
 0x157   : > { %v1522_v19 = vadd.f32 %v1521_v17, %v1520_v16 }
 0x159   : > { %v1524_v20 = vsel %vm1523_vm2, %v1453_v18, %v1522_v19 }
 0x15a   : > { %1525 = vst [vmem:[%s214_s6] sm:$0x3] %v1524_v20 }
 0x15b PF: > { %s14_s14 = sadd.s32 1, %s2323_s14   ;;  %s2534_s12 = smov %s2319_s13 }
 0x15c   : > { %p11_p5 = scmp.ge.s32.totalorder %s14_s14, 4   ;;  %s2535_s13 = smov %s2537_s15 }
 0x15e   :  { %13 = sbr.rel (!%p11_p5) target bundleno = 2 (0x2), region = 75 }

</bundles_post_ra>
